<compile_context>
chip_gen: v7x
topology: tpu7x:2x2x1
jax: 0.10.0
libtpu: 0.0.40
codegen_flags: <defaults>
</compile_context>

<pallas_src>
import functools

import numpy as np

import jax
import jax.numpy as jnp
from jax import lax
from jax.experimental import pallas as pl
from jax.experimental.pallas import tpu as pltpu


def _up_conv_kernel(x_ref, w_ref, m_ref, o_ref, patches_ref, *,
                    Nb, W, HW, C_in_p, eps, neg_slope, compute_dtype):
    # x_ref:       (Nb, C_in_p, HW) f32  -- channel-first, H*W flattened onto lanes
    # w_ref:       (C_out, 9*C_in_p)     -- compute_dtype, columns ordered (ky, kx, ci)
    # m_ref:       (9, HW) f32           -- per-tap border masks (fused zero padding)
    # o_ref:       (Nb, C_out, HW)
    # patches_ref: (9*C_in_p, HW)        -- compute_dtype im2col scratch (single copy)
    inv_hw = 1.0 / HW
    for nb in range(Nb):
        x = x_ref[nb]                                           # (C_in_p, HW) f32

        # Transposed im2col written tap-by-tap straight into the scratch.
        for ky in range(3):
            for kx in range(3):
                dy, dx = ky - 1, kx - 1
                d = dy * W + dx                                 # lane shift for tap
                tap = ky * 3 + kx
                shifted = x if d == 0 else pltpu.roll(x, shift=(-d) % HW, axis=1)
                if not (dy == 0 and dx == 0):
                    shifted = shifted * m_ref[tap:tap + 1, :]   # zero wrapped lanes
                patches_ref[tap * C_in_p:(tap + 1) * C_in_p, :] = (
                    shifted.astype(compute_dtype))

        # One MXU matmul per sample: (C_out, 9*C_in_p) x (9*C_in_p, HW), f32 acc.
        acc = lax.dot_general(
            w_ref[...], patches_ref[...],
            dimension_numbers=(((1,), (0,)), ((), ())),
            preferred_element_type=jnp.float32,
        )                                                       # (C_out, HW) f32

        # InstanceNorm2d(affine=False): per-channel stats over HW, two-pass.
        mean = jnp.sum(acc, axis=1, keepdims=True) * inv_hw
        xc = acc - mean
        var = jnp.sum(xc * xc, axis=1, keepdims=True) * inv_hw
        y = xc * lax.rsqrt(var + eps)

        # LeakyReLU(0.01): max(y, a*y) for 0 < a < 1.
        y = jnp.maximum(y, neg_slope * y)

        o_ref[nb] = y.astype(o_ref.dtype)                       # lane-dense store


def _pick_batch_block(n, cap=8):
    for nb in range(min(n, cap), 0, -1):
        if n % nb == 0:
            return nb
    return 1


def up_conv_block(x_nchw, weight_oihw, bias=None, *, eps=1e-5, neg_slope=0.01,
                  compute_dtype=jnp.bfloat16, batch_block=None):
    """x_nchw: (N, C_in, H, W); weight_oihw: (C_out, C_in, 3, 3); bias: (C_out,).

    Returns (N, C_out, H, W). `bias` is accepted for API parity with the PyTorch
    module but is mathematically cancelled by InstanceNorm's mean subtraction.
    """
    del bias
    N, C_in, H, W = x_nchw.shape
    C_out = weight_oihw.shape[0]
    HW = H * W

    # Pad C_in to the native sublane tile of compute_dtype (8 for f32, 16 for bf16)
    # so the per-tap scratch stores are tile-aligned.
    sub = 8 * 4 // jnp.dtype(compute_dtype).itemsize
    C_in_p = ((C_in + sub - 1) // sub) * sub
    K = 9 * C_in_p

    Nb = batch_block or _pick_batch_block(N)
    num_steps = N // Nb

    # Channel-first; flattening H*W onto the lane axis is a free reshape.
    x_flat = x_nchw.reshape(N, C_in, HW)
    if C_in_p != C_in:
        x_flat = jnp.pad(x_flat, ((0, 0), (0, C_in_p - C_in), (0, 0)))

    # OIHW -> (C_out, 9*C_in_p), columns ordered (ky, kx, ci); cast for the MXU.
    w_khwc = jnp.transpose(weight_oihw, (0, 2, 3, 1))          # (C_out, 3, 3, C_in)
    if C_in_p != C_in:
        w_khwc = jnp.pad(w_khwc, ((0, 0), (0, 0), (0, 0), (0, C_in_p - C_in)))
    w_r = w_khwc.reshape(C_out, K).astype(compute_dtype)

    # Static (9, HW) border masks: the conv's zero padding fused into the kernel.
    hh, ww = np.meshgrid(np.arange(H), np.arange(W), indexing="ij")
    masks_np = np.zeros((9, HW), np.float32)
    for ky in range(3):
        for kx in range(3):
            dy, dx = ky - 1, kx - 1
            valid = ((hh + dy >= 0) & (hh + dy < H) &
                     (ww + dx >= 0) & (ww + dx < W))
            masks_np[ky * 3 + kx, :] = valid.reshape(-1).astype(np.float32)
    masks = jnp.asarray(masks_np)

    kernel = functools.partial(
        _up_conv_kernel, Nb=Nb, W=W, HW=HW, C_in_p=C_in_p, eps=eps,
        neg_slope=neg_slope, compute_dtype=compute_dtype)

    # VMEM budget: double-buffered streams + the single-copy im2col scratch.
    cd_bytes = jnp.dtype(compute_dtype).itemsize
    est = (2 * (Nb * C_in_p * HW * 4          # x block
                + C_out * K * cd_bytes        # weights
                + 16 * HW * 4                 # masks (9 -> 16 sublane pad)
                + Nb * C_out * HW * 4)        # output block
           + K * HW * cd_bytes                # patches scratch
           + 4 * C_out * HW * 4)              # acc / centered / y temporaries
    vmem_limit = int(min(max(32 * 1024 * 1024, 2 * est), 100 * 1024 * 1024))

    x_spec_kwargs = {}
    if num_steps >= 3:
        # Deepen the only per-step input stream when the grid is long enough
        # for DMA latency to be exposed.
        x_spec_kwargs["pipeline_mode"] = pl.Buffered(3)
    x_spec = pl.BlockSpec((Nb, C_in_p, HW), lambda n: (n, 0, 0), **x_spec_kwargs)

    out_flat = pl.pallas_call(
        kernel,
        out_shape=jax.ShapeDtypeStruct((N, C_out, HW), x_nchw.dtype),
        grid_spec=pltpu.PrefetchScalarGridSpec(
            num_scalar_prefetch=0,
            grid=(num_steps,),
            in_specs=[
                x_spec,
                pl.BlockSpec((C_out, K), lambda n: (0, 0)),
                pl.BlockSpec((9, HW), lambda n: (0, 0)),
            ],
            out_specs=pl.BlockSpec((Nb, C_out, HW), lambda n: (n, 0, 0)),
            scratch_shapes=[pltpu.VMEM((K, HW), compute_dtype)],
        ),
        compiler_params=pltpu.CompilerParams(
            dimension_semantics=("parallel",),
            vmem_limit_bytes=vmem_limit,
        ),
    )(x_flat, w_r, masks)

    return out_flat.reshape(N, C_out, H, W)


def _reference(x_nchw, weight_oihw, bias, eps=1e-5, neg_slope=0.01):
    """Pure-JAX reference mirroring PyTorch semantics (with conv bias)."""
    y = lax.conv_general_dilated(
        x_nchw, weight_oihw, window_strides=(1, 1), padding=((1, 1), (1, 1)),
        dimension_numbers=("NCHW", "OIHW", "NCHW"),
    ) + bias.reshape(1, -1, 1, 1)
    mean = jnp.mean(y, axis=(2, 3), keepdims=True)
    var = jnp.mean((y - mean) ** 2, axis=(2, 3), keepdims=True)
    y = (y - mean) * lax.rsqrt(var + eps)
    return jnp.where(y >= 0, y, neg_slope * y)


if __name__ == "__main__":
    N, C_in, C_out, H, W = 2, 4, 8, 16, 16
    key = jax.random.PRNGKey(0)
    kx_, kw_, kb_ = jax.random.split(key, 3)

    x = jax.random.normal(kx_, (N, C_in, H, W), dtype=jnp.float32)
    fan_in = C_in * 3 * 3
    bound = 1.0 / (fan_in ** 0.5)
    weight = jax.random.uniform(kw_, (C_out, C_in, 3, 3), jnp.float32, -bound, bound)
    bias = jax.random.uniform(kb_, (C_out,), jnp.float32, -bound, bound)

    ref = _reference(x, weight, bias)

    # f32 compute path: tight check against the f32 reference.
    out_f32 = jax.block_until_ready(
        up_conv_block(x, weight, bias, compute_dtype=jnp.float32))
    assert out_f32.shape == (N, C_out, H, W)
    assert jnp.allclose(out_f32, ref, atol=1e-4, rtol=1e-4), "f32 mismatch vs reference"

    # bf16 MXU path (default): looser tolerance for bf16 operand rounding.
    out_bf16 = jax.block_until_ready(
        up_conv_block(x, weight, bias, compute_dtype=jnp.bfloat16))
    assert out_bf16.shape == (N, C_out, H, W)
    assert jnp.allclose(out_bf16, ref, atol=5e-2, rtol=5e-2), "bf16 mismatch vs reference"

    print("KERNEL_OK")
</pallas_src>

<mosaic_0001>
module attributes {stable_mosaic.version = 11 : i64} {
  func.func @_up_conv_kernel(%arg0: i32, %arg1: memref<2x8x256xf32, #tpu.memory_space<vmem>>, %arg2: memref<8x72xf32, #tpu.memory_space<vmem>>, %arg3: memref<9x256xf32, #tpu.memory_space<vmem>>, %arg4: memref<2x8x256xf32, #tpu.memory_space<vmem>>, %arg5: memref<72x256xf32, #tpu.memory_space<vmem>>) attributes {dimension_semantics = [#tpu.dimension_semantics<parallel>], iteration_bounds = array<i64: 1>, scalar_prefetch = 0 : i64, scratch_operands = 1 : i64, tpu.core_type = #tpu.core_type<tc>, window_params = [{transform_indices = @transform_0, window_bounds = array<i64: 2, 8, 256>}, {pipeline_mode = #tpu.pipeline_mode<synchronous>, transform_indices = @transform_1, window_bounds = array<i64: 8, 72>}, {pipeline_mode = #tpu.pipeline_mode<synchronous>, transform_indices = @transform_2, window_bounds = array<i64: 9, 256>}, {transform_indices = @transform_3, window_bounds = array<i64: 2, 8, 256>}]} {
    %c0 = arith.constant 0 : index
    %c0_0 = arith.constant 0 : index
    %c0_1 = arith.constant 0 : index
    %0 = vector.load %arg1[%c0, %c0_0, %c0_1] : memref<2x8x256xf32, #tpu.memory_space<vmem>>, vector<1x8x256xf32>
    %1 = vector.shape_cast %0 : vector<1x8x256xf32> to vector<8x256xf32>
    %c17_i32 = arith.constant 17 : i32
    %2 = tpu.dynamic_rotate %1 by %c17_i32 dim 1 : vector<8x256xf32>, i32 -> vector<8x256xf32>
    %c0_2 = arith.constant 0 : index
    %c0_3 = arith.constant 0 : index
    %3 = vector.load %arg3[%c0_2, %c0_3] : memref<9x256xf32, #tpu.memory_space<vmem>>, vector<1x256xf32>
    %4 = vector.broadcast %3 : vector<1x256xf32> to vector<8x256xf32>
    %5 = arith.mulf %2, %4 : vector<8x256xf32>
    %c0_4 = arith.constant 0 : index
    %c0_5 = arith.constant 0 : index
    %6 = vector.load %arg5[%c0_4, %c0_5] : memref<72x256xf32, #tpu.memory_space<vmem>>, vector<8x256xf32>
    tpu.vector_store %arg5[%c0_4, %c0_5], %5 {strides = array<i32>} : memref<72x256xf32, #tpu.memory_space<vmem>>, vector<8x256xf32>,
    %c16_i32 = arith.constant 16 : i32
    %7 = tpu.dynamic_rotate %1 by %c16_i32 dim 1 : vector<8x256xf32>, i32 -> vector<8x256xf32>
    %c1 = arith.constant 1 : index
    %c0_6 = arith.constant 0 : index
    %8 = vector.load %arg3[%c1, %c0_6] : memref<9x256xf32, #tpu.memory_space<vmem>>, vector<1x256xf32>
    %9 = vector.broadcast %8 : vector<1x256xf32> to vector<8x256xf32>
    %10 = arith.mulf %7, %9 : vector<8x256xf32>
    %c8 = arith.constant 8 : index
    %c0_7 = arith.constant 0 : index
    %11 = vector.load %arg5[%c8, %c0_7] : memref<72x256xf32, #tpu.memory_space<vmem>>, vector<8x256xf32>
    tpu.vector_store %arg5[%c8, %c0_7], %10 {strides = array<i32>} : memref<72x256xf32, #tpu.memory_space<vmem>>, vector<8x256xf32>,
    %c15_i32 = arith.constant 15 : i32
    %12 = tpu.dynamic_rotate %1 by %c15_i32 dim 1 : vector<8x256xf32>, i32 -> vector<8x256xf32>
    %c2 = arith.constant 2 : index
    %c0_8 = arith.constant 0 : index
    %13 = vector.load %arg3[%c2, %c0_8] : memref<9x256xf32, #tpu.memory_space<vmem>>, vector<1x256xf32>
    %14 = vector.broadcast %13 : vector<1x256xf32> to vector<8x256xf32>
    %15 = arith.mulf %12, %14 : vector<8x256xf32>
    %c16 = arith.constant 16 : index
    %c0_9 = arith.constant 0 : index
    %16 = vector.load %arg5[%c16, %c0_9] : memref<72x256xf32, #tpu.memory_space<vmem>>, vector<8x256xf32>
    tpu.vector_store %arg5[%c16, %c0_9], %15 {strides = array<i32>} : memref<72x256xf32, #tpu.memory_space<vmem>>, vector<8x256xf32>,
    %c1_i32 = arith.constant 1 : i32
    %17 = tpu.dynamic_rotate %1 by %c1_i32 dim 1 : vector<8x256xf32>, i32 -> vector<8x256xf32>
    %c3 = arith.constant 3 : index
    %c0_10 = arith.constant 0 : index
    %18 = vector.load %arg3[%c3, %c0_10] : memref<9x256xf32, #tpu.memory_space<vmem>>, vector<1x256xf32>
    %19 = vector.broadcast %18 : vector<1x256xf32> to vector<8x256xf32>
    %20 = arith.mulf %17, %19 : vector<8x256xf32>
    %c24 = arith.constant 24 : index
    %c0_11 = arith.constant 0 : index
    %21 = vector.load %arg5[%c24, %c0_11] : memref<72x256xf32, #tpu.memory_space<vmem>>, vector<8x256xf32>
    tpu.vector_store %arg5[%c24, %c0_11], %20 {strides = array<i32>} : memref<72x256xf32, #tpu.memory_space<vmem>>, vector<8x256xf32>,
    %c32 = arith.constant 32 : index
    %c0_12 = arith.constant 0 : index
    %22 = vector.load %arg5[%c32, %c0_12] : memref<72x256xf32, #tpu.memory_space<vmem>>, vector<8x256xf32>
    tpu.vector_store %arg5[%c32, %c0_12], %1 {strides = array<i32>} : memref<72x256xf32, #tpu.memory_space<vmem>>, vector<8x256xf32>,
    %c255_i32 = arith.constant 255 : i32
    %23 = tpu.dynamic_rotate %1 by %c255_i32 dim 1 : vector<8x256xf32>, i32 -> vector<8x256xf32>
    %c5 = arith.constant 5 : index
    %c0_13 = arith.constant 0 : index
    %24 = vector.load %arg3[%c5, %c0_13] : memref<9x256xf32, #tpu.memory_space<vmem>>, vector<1x256xf32>
    %25 = vector.broadcast %24 : vector<1x256xf32> to vector<8x256xf32>
    %26 = arith.mulf %23, %25 : vector<8x256xf32>
    %c40 = arith.constant 40 : index
    %c0_14 = arith.constant 0 : index
    %27 = vector.load %arg5[%c40, %c0_14] : memref<72x256xf32, #tpu.memory_space<vmem>>, vector<8x256xf32>
    tpu.vector_store %arg5[%c40, %c0_14], %26 {strides = array<i32>} : memref<72x256xf32, #tpu.memory_space<vmem>>, vector<8x256xf32>,
    %c241_i32 = arith.constant 241 : i32
    %28 = tpu.dynamic_rotate %1 by %c241_i32 dim 1 : vector<8x256xf32>, i32 -> vector<8x256xf32>
    %c6 = arith.constant 6 : index
    %c0_15 = arith.constant 0 : index
    %29 = vector.load %arg3[%c6, %c0_15] : memref<9x256xf32, #tpu.memory_space<vmem>>, vector<1x256xf32>
    %30 = vector.broadcast %29 : vector<1x256xf32> to vector<8x256xf32>
    %31 = arith.mulf %28, %30 : vector<8x256xf32>
    %c48 = arith.constant 48 : index
    %c0_16 = arith.constant 0 : index
    %32 = vector.load %arg5[%c48, %c0_16] : memref<72x256xf32, #tpu.memory_space<vmem>>, vector<8x256xf32>
    tpu.vector_store %arg5[%c48, %c0_16], %31 {strides = array<i32>} : memref<72x256xf32, #tpu.memory_space<vmem>>, vector<8x256xf32>,
    %c240_i32 = arith.constant 240 : i32
    %33 = tpu.dynamic_rotate %1 by %c240_i32 dim 1 : vector<8x256xf32>, i32 -> vector<8x256xf32>
    %c7 = arith.constant 7 : index
    %c0_17 = arith.constant 0 : index
    %34 = vector.load %arg3[%c7, %c0_17] : memref<9x256xf32, #tpu.memory_space<vmem>>, vector<1x256xf32>
    %35 = vector.broadcast %34 : vector<1x256xf32> to vector<8x256xf32>
    %36 = arith.mulf %33, %35 : vector<8x256xf32>
    %c56 = arith.constant 56 : index
    %c0_18 = arith.constant 0 : index
    %37 = vector.load %arg5[%c56, %c0_18] : memref<72x256xf32, #tpu.memory_space<vmem>>, vector<8x256xf32>
    tpu.vector_store %arg5[%c56, %c0_18], %36 {strides = array<i32>} : memref<72x256xf32, #tpu.memory_space<vmem>>, vector<8x256xf32>,
    %c239_i32 = arith.constant 239 : i32
    %38 = tpu.dynamic_rotate %1 by %c239_i32 dim 1 : vector<8x256xf32>, i32 -> vector<8x256xf32>
    %c8_19 = arith.constant 8 : index
    %c0_20 = arith.constant 0 : index
    %39 = vector.load %arg3[%c8_19, %c0_20] : memref<9x256xf32, #tpu.memory_space<vmem>>, vector<1x256xf32>
    %40 = vector.broadcast %39 : vector<1x256xf32> to vector<8x256xf32>
    %41 = arith.mulf %38, %40 : vector<8x256xf32>
    %c64 = arith.constant 64 : index
    %c0_21 = arith.constant 0 : index
    %42 = vector.load %arg5[%c64, %c0_21] : memref<72x256xf32, #tpu.memory_space<vmem>>, vector<8x256xf32>
    tpu.vector_store %arg5[%c64, %c0_21], %41 {strides = array<i32>} : memref<72x256xf32, #tpu.memory_space<vmem>>, vector<8x256xf32>,
    %c0_22 = arith.constant 0 : index
    %c0_23 = arith.constant 0 : index
    %43 = vector.load %arg2[%c0_22, %c0_23] : memref<8x72xf32, #tpu.memory_space<vmem>>, vector<8x72xf32>
    %c0_24 = arith.constant 0 : index
    %c0_25 = arith.constant 0 : index
    %44 = vector.load %arg5[%c0_24, %c0_25] : memref<72x256xf32, #tpu.memory_space<vmem>>, vector<72x256xf32>
    %cst = arith.constant dense<0.000000e+00> : vector<8x256xf32>
    %45 = tpu.matmul %43, %44, %cst {dimension_numbers = #tpu.dot_dimension_numbers<[1], [0], [0], [1], [0, 0, 1, 1], [], []>} : vector<8x72xf32>, vector<72x256xf32>, vector<8x256xf32> -> vector<8x256xf32>
    %cst_26 = arith.constant dense<0.000000e+00> : vector<8xf32>
    %46 = vector.multi_reduction <add>, %45, %cst_26 [1] : vector<8x256xf32> to vector<8xf32>
    %47 = vector.shape_cast %46 : vector<8xf32> to vector<8x1xf32>
    %cst_27 = arith.constant 3.906250e-03 : f32
    %48 = vector.broadcast %cst_27 : f32 to vector<8x1xf32>
    %49 = arith.mulf %47, %48 : vector<8x1xf32>
    %50 = vector.broadcast %49 : vector<8x1xf32> to vector<8x256xf32>
    %51 = arith.subf %45, %50 : vector<8x256xf32>
    %52 = arith.mulf %51, %51 : vector<8x256xf32>
    %cst_28 = arith.constant dense<0.000000e+00> : vector<8xf32>
    %53 = vector.multi_reduction <add>, %52, %cst_28 [1] : vector<8x256xf32> to vector<8xf32>
    %54 = vector.shape_cast %53 : vector<8xf32> to vector<8x1xf32>
    %cst_29 = arith.constant 3.906250e-03 : f32
    %55 = vector.broadcast %cst_29 : f32 to vector<8x1xf32>
    %56 = arith.mulf %54, %55 : vector<8x1xf32>
    %cst_30 = arith.constant 9.99999974E-6 : f32
    %57 = vector.broadcast %cst_30 : f32 to vector<8x1xf32>
    %58 = arith.addf %56, %57 : vector<8x1xf32>
    %59 = math.rsqrt %58 : vector<8x1xf32>
    %60 = vector.broadcast %59 : vector<8x1xf32> to vector<8x256xf32>
    %61 = arith.mulf %51, %60 : vector<8x256xf32>
    %cst_31 = arith.constant 0.00999999977 : f32
    %62 = vector.broadcast %cst_31 : f32 to vector<8x256xf32>
    %63 = arith.mulf %62, %61 : vector<8x256xf32>
    %64 = arith.maximumf %61, %63 : vector<8x256xf32>
    %c0_32 = arith.constant 0 : index
    %c0_33 = arith.constant 0 : index
    %c0_34 = arith.constant 0 : index
    %65 = vector.load %arg4[%c0_32, %c0_33, %c0_34] : memref<2x8x256xf32, #tpu.memory_space<vmem>>, vector<1x8x256xf32>
    %66 = vector.shape_cast %65 : vector<1x8x256xf32> to vector<8x256xf32>
    %67 = vector.shape_cast %64 : vector<8x256xf32> to vector<1x8x256xf32>
    tpu.vector_store %arg4[%c0_32, %c0_33, %c0_34], %67 {strides = array<i32>} : memref<2x8x256xf32, #tpu.memory_space<vmem>>, vector<1x8x256xf32>,
    %c1_35 = arith.constant 1 : index
    %c0_36 = arith.constant 0 : index
    %c0_37 = arith.constant 0 : index
    %68 = vector.load %arg1[%c1_35, %c0_36, %c0_37] : memref<2x8x256xf32, #tpu.memory_space<vmem>>, vector<1x8x256xf32>
    %69 = vector.shape_cast %68 : vector<1x8x256xf32> to vector<8x256xf32>
    %c17_i32_38 = arith.constant 17 : i32
    %70 = tpu.dynamic_rotate %69 by %c17_i32_38 dim 1 : vector<8x256xf32>, i32 -> vector<8x256xf32>
    %c0_39 = arith.constant 0 : index
    %c0_40 = arith.constant 0 : index
    %71 = vector.load %arg3[%c0_39, %c0_40] : memref<9x256xf32, #tpu.memory_space<vmem>>, vector<1x256xf32>
    %72 = vector.broadcast %71 : vector<1x256xf32> to vector<8x256xf32>
    %73 = arith.mulf %70, %72 : vector<8x256xf32>
    %c0_41 = arith.constant 0 : index
    %c0_42 = arith.constant 0 : index
    %74 = vector.load %arg5[%c0_41, %c0_42] : memref<72x256xf32, #tpu.memory_space<vmem>>, vector<8x256xf32>
    tpu.vector_store %arg5[%c0_41, %c0_42], %73 {strides = array<i32>} : memref<72x256xf32, #tpu.memory_space<vmem>>, vector<8x256xf32>,
    %c16_i32_43 = arith.constant 16 : i32
    %75 = tpu.dynamic_rotate %69 by %c16_i32_43 dim 1 : vector<8x256xf32>, i32 -> vector<8x256xf32>
    %c1_44 = arith.constant 1 : index
    %c0_45 = arith.constant 0 : index
    %76 = vector.load %arg3[%c1_44, %c0_45] : memref<9x256xf32, #tpu.memory_space<vmem>>, vector<1x256xf32>
    %77 = vector.broadcast %76 : vector<1x256xf32> to vector<8x256xf32>
    %78 = arith.mulf %75, %77 : vector<8x256xf32>
    %c8_46 = arith.constant 8 : index
    %c0_47 = arith.constant 0 : index
    %79 = vector.load %arg5[%c8_46, %c0_47] : memref<72x256xf32, #tpu.memory_space<vmem>>, vector<8x256xf32>
    tpu.vector_store %arg5[%c8_46, %c0_47], %78 {strides = array<i32>} : memref<72x256xf32, #tpu.memory_space<vmem>>, vector<8x256xf32>,
    %c15_i32_48 = arith.constant 15 : i32
    %80 = tpu.dynamic_rotate %69 by %c15_i32_48 dim 1 : vector<8x256xf32>, i32 -> vector<8x256xf32>
    %c2_49 = arith.constant 2 : index
    %c0_50 = arith.constant 0 : index
    %81 = vector.load %arg3[%c2_49, %c0_50] : memref<9x256xf32, #tpu.memory_space<vmem>>, vector<1x256xf32>
    %82 = vector.broadcast %81 : vector<1x256xf32> to vector<8x256xf32>
    %83 = arith.mulf %80, %82 : vector<8x256xf32>
    %c16_51 = arith.constant 16 : index
    %c0_52 = arith.constant 0 : index
    %84 = vector.load %arg5[%c16_51, %c0_52] : memref<72x256xf32, #tpu.memory_space<vmem>>, vector<8x256xf32>
    tpu.vector_store %arg5[%c16_51, %c0_52], %83 {strides = array<i32>} : memref<72x256xf32, #tpu.memory_space<vmem>>, vector<8x256xf32>,
    %c1_i32_53 = arith.constant 1 : i32
    %85 = tpu.dynamic_rotate %69 by %c1_i32_53 dim 1 : vector<8x256xf32>, i32 -> vector<8x256xf32>
    %c3_54 = arith.constant 3 : index
    %c0_55 = arith.constant 0 : index
    %86 = vector.load %arg3[%c3_54, %c0_55] : memref<9x256xf32, #tpu.memory_space<vmem>>, vector<1x256xf32>
    %87 = vector.broadcast %86 : vector<1x256xf32> to vector<8x256xf32>
    %88 = arith.mulf %85, %87 : vector<8x256xf32>
    %c24_56 = arith.constant 24 : index
    %c0_57 = arith.constant 0 : index
    %89 = vector.load %arg5[%c24_56, %c0_57] : memref<72x256xf32, #tpu.memory_space<vmem>>, vector<8x256xf32>
    tpu.vector_store %arg5[%c24_56, %c0_57], %88 {strides = array<i32>} : memref<72x256xf32, #tpu.memory_space<vmem>>, vector<8x256xf32>,
    %c32_58 = arith.constant 32 : index
    %c0_59 = arith.constant 0 : index
    %90 = vector.load %arg5[%c32_58, %c0_59] : memref<72x256xf32, #tpu.memory_space<vmem>>, vector<8x256xf32>
    tpu.vector_store %arg5[%c32_58, %c0_59], %69 {strides = array<i32>} : memref<72x256xf32, #tpu.memory_space<vmem>>, vector<8x256xf32>,
    %c255_i32_60 = arith.constant 255 : i32
    %91 = tpu.dynamic_rotate %69 by %c255_i32_60 dim 1 : vector<8x256xf32>, i32 -> vector<8x256xf32>
    %c5_61 = arith.constant 5 : index
    %c0_62 = arith.constant 0 : index
    %92 = vector.load %arg3[%c5_61, %c0_62] : memref<9x256xf32, #tpu.memory_space<vmem>>, vector<1x256xf32>
    %93 = vector.broadcast %92 : vector<1x256xf32> to vector<8x256xf32>
    %94 = arith.mulf %91, %93 : vector<8x256xf32>
    %c40_63 = arith.constant 40 : index
    %c0_64 = arith.constant 0 : index
    %95 = vector.load %arg5[%c40_63, %c0_64] : memref<72x256xf32, #tpu.memory_space<vmem>>, vector<8x256xf32>
    tpu.vector_store %arg5[%c40_63, %c0_64], %94 {strides = array<i32>} : memref<72x256xf32, #tpu.memory_space<vmem>>, vector<8x256xf32>,
    %c241_i32_65 = arith.constant 241 : i32
    %96 = tpu.dynamic_rotate %69 by %c241_i32_65 dim 1 : vector<8x256xf32>, i32 -> vector<8x256xf32>
    %c6_66 = arith.constant 6 : index
    %c0_67 = arith.constant 0 : index
    %97 = vector.load %arg3[%c6_66, %c0_67] : memref<9x256xf32, #tpu.memory_space<vmem>>, vector<1x256xf32>
    %98 = vector.broadcast %97 : vector<1x256xf32> to vector<8x256xf32>
    %99 = arith.mulf %96, %98 : vector<8x256xf32>
    %c48_68 = arith.constant 48 : index
    %c0_69 = arith.constant 0 : index
    %100 = vector.load %arg5[%c48_68, %c0_69] : memref<72x256xf32, #tpu.memory_space<vmem>>, vector<8x256xf32>
    tpu.vector_store %arg5[%c48_68, %c0_69], %99 {strides = array<i32>} : memref<72x256xf32, #tpu.memory_space<vmem>>, vector<8x256xf32>,
    %c240_i32_70 = arith.constant 240 : i32
    %101 = tpu.dynamic_rotate %69 by %c240_i32_70 dim 1 : vector<8x256xf32>, i32 -> vector<8x256xf32>
    %c7_71 = arith.constant 7 : index
    %c0_72 = arith.constant 0 : index
    %102 = vector.load %arg3[%c7_71, %c0_72] : memref<9x256xf32, #tpu.memory_space<vmem>>, vector<1x256xf32>
    %103 = vector.broadcast %102 : vector<1x256xf32> to vector<8x256xf32>
    %104 = arith.mulf %101, %103 : vector<8x256xf32>
    %c56_73 = arith.constant 56 : index
    %c0_74 = arith.constant 0 : index
    %105 = vector.load %arg5[%c56_73, %c0_74] : memref<72x256xf32, #tpu.memory_space<vmem>>, vector<8x256xf32>
    tpu.vector_store %arg5[%c56_73, %c0_74], %104 {strides = array<i32>} : memref<72x256xf32, #tpu.memory_space<vmem>>, vector<8x256xf32>,
    %c239_i32_75 = arith.constant 239 : i32
    %106 = tpu.dynamic_rotate %69 by %c239_i32_75 dim 1 : vector<8x256xf32>, i32 -> vector<8x256xf32>
    %c8_76 = arith.constant 8 : index
    %c0_77 = arith.constant 0 : index
    %107 = vector.load %arg3[%c8_76, %c0_77] : memref<9x256xf32, #tpu.memory_space<vmem>>, vector<1x256xf32>
    %108 = vector.broadcast %107 : vector<1x256xf32> to vector<8x256xf32>
    %109 = arith.mulf %106, %108 : vector<8x256xf32>
    %c64_78 = arith.constant 64 : index
    %c0_79 = arith.constant 0 : index
    %110 = vector.load %arg5[%c64_78, %c0_79] : memref<72x256xf32, #tpu.memory_space<vmem>>, vector<8x256xf32>
    tpu.vector_store %arg5[%c64_78, %c0_79], %109 {strides = array<i32>} : memref<72x256xf32, #tpu.memory_space<vmem>>, vector<8x256xf32>,
    %c0_80 = arith.constant 0 : index
    %c0_81 = arith.constant 0 : index
    %111 = vector.load %arg2[%c0_80, %c0_81] : memref<8x72xf32, #tpu.memory_space<vmem>>, vector<8x72xf32>
    %c0_82 = arith.constant 0 : index
    %c0_83 = arith.constant 0 : index
    %112 = vector.load %arg5[%c0_82, %c0_83] : memref<72x256xf32, #tpu.memory_space<vmem>>, vector<72x256xf32>
    %cst_84 = arith.constant dense<0.000000e+00> : vector<8x256xf32>
    %113 = tpu.matmul %111, %112, %cst_84 {dimension_numbers = #tpu.dot_dimension_numbers<[1], [0], [0], [1], [0, 0, 1, 1], [], []>} : vector<8x72xf32>, vector<72x256xf32>, vector<8x256xf32> -> vector<8x256xf32>
    %cst_85 = arith.constant dense<0.000000e+00> : vector<8xf32>
    %114 = vector.multi_reduction <add>, %113, %cst_85 [1] : vector<8x256xf32> to vector<8xf32>
    %115 = vector.shape_cast %114 : vector<8xf32> to vector<8x1xf32>
    %cst_86 = arith.constant 3.906250e-03 : f32
    %116 = vector.broadcast %cst_86 : f32 to vector<8x1xf32>
    %117 = arith.mulf %115, %116 : vector<8x1xf32>
    %118 = vector.broadcast %117 : vector<8x1xf32> to vector<8x256xf32>
    %119 = arith.subf %113, %118 : vector<8x256xf32>
    %120 = arith.mulf %119, %119 : vector<8x256xf32>
    %cst_87 = arith.constant dense<0.000000e+00> : vector<8xf32>
    %121 = vector.multi_reduction <add>, %120, %cst_87 [1] : vector<8x256xf32> to vector<8xf32>
    %122 = vector.shape_cast %121 : vector<8xf32> to vector<8x1xf32>
    %cst_88 = arith.constant 3.906250e-03 : f32
    %123 = vector.broadcast %cst_88 : f32 to vector<8x1xf32>
    %124 = arith.mulf %122, %123 : vector<8x1xf32>
    %cst_89 = arith.constant 9.99999974E-6 : f32
    %125 = vector.broadcast %cst_89 : f32 to vector<8x1xf32>
    %126 = arith.addf %124, %125 : vector<8x1xf32>
    %127 = math.rsqrt %126 : vector<8x1xf32>
    %128 = vector.broadcast %127 : vector<8x1xf32> to vector<8x256xf32>
    %129 = arith.mulf %119, %128 : vector<8x256xf32>
    %cst_90 = arith.constant 0.00999999977 : f32
    %130 = vector.broadcast %cst_90 : f32 to vector<8x256xf32>
    %131 = arith.mulf %130, %129 : vector<8x256xf32>
    %132 = arith.maximumf %129, %131 : vector<8x256xf32>
    %c1_91 = arith.constant 1 : index
    %c0_92 = arith.constant 0 : index
    %c0_93 = arith.constant 0 : index
    %133 = vector.load %arg4[%c1_91, %c0_92, %c0_93] : memref<2x8x256xf32, #tpu.memory_space<vmem>>, vector<1x8x256xf32>
    %134 = vector.shape_cast %133 : vector<1x8x256xf32> to vector<8x256xf32>
    %135 = vector.shape_cast %132 : vector<8x256xf32> to vector<1x8x256xf32>
    tpu.vector_store %arg4[%c1_91, %c0_92, %c0_93], %135 {strides = array<i32>} : memref<2x8x256xf32, #tpu.memory_space<vmem>>, vector<1x8x256xf32>,
    return
  }
  func.func @transform_0(%arg0: i32) -> (i32, i32, i32) {
    %c0_i32 = arith.constant 0 : i32
    %c0_i32_0 = arith.constant 0 : i32
    %c0_i32_1 = arith.constant 0 : i32
    return %arg0, %c0_i32, %c0_i32_0 : i32, i32, i32
  }
  func.func @transform_1(%arg0: i32) -> (i32, i32) {
    %c0_i32 = arith.constant 0 : i32
    %c0_i32_0 = arith.constant 0 : i32
    %c0_i32_1 = arith.constant 0 : i32
    return %c0_i32, %c0_i32_0 : i32, i32
  }
  func.func @transform_2(%arg0: i32) -> (i32, i32) {
    %c0_i32 = arith.constant 0 : i32
    %c0_i32_0 = arith.constant 0 : i32
    %c0_i32_1 = arith.constant 0 : i32
    return %c0_i32, %c0_i32_0 : i32, i32
  }
  func.func @transform_3(%arg0: i32) -> (i32, i32, i32) {
    %c0_i32 = arith.constant 0 : i32
    %c0_i32_0 = arith.constant 0 : i32
    %c0_i32_1 = arith.constant 0 : i32
    return %arg0, %c0_i32, %c0_i32_0 : i32, i32, i32
  }
}

</mosaic_0001>

<bundles_post_ra>
// kernel: tpu_custom_call.1
= control target key start
LH: loop header
LB: loop body
LE: loop exit
PB: predicated region body
PF: predicated region fallthrough
CT: control target
= control target key end

     0   :  { %8 = vsyncpa [#allocation4], 0  ;;  %s1084_s0 = inlined_call_operand.hbm [shape: f32[2,8,256], index: 0, kind: input, shape index: {}]   ;;  %s1085_s1 = inlined_call_operand.hbm [shape: f32[8,72], index: 1, kind: input, shape index: {}]   ;;  %s1086_s2 = inlined_call_operand.hbm [shape: f32[9,256], index: 2, kind: input, shape index: {}]   ;;  %s1087_s3 = inlined_call_operand.hbm [shape: f32[2,8,256], index: 3, kind: output, shape index: {}]  }
   0x1   :  { %9 = vsyncpa [#allocation7], 0 }
   0x2   :  { %10 = vsyncpa [#allocation5], 0  ;;  %s828_s12 = smov [#allocation6]   ;;  %s829_s14 = smov [#allocation3]  }
   0x3   :  { %s29_s13 = sshll.u32 %s828_s12, 4  ;;  %s16_s15 = sshll.u32 %s829_s14, 4  ;;  %s30_s13 = int_to_ptr.vmem [resolvable:$true] %s29_s13  ;;  %s862_s15 = int_to_ptr.vmem [resolvable:$true] %s16_s15 }
   0x4   :  { %s734_s18 = scalar_lea.hbm %s1085_s1, 128 }
   0x5   :  { %p735_p0 = scmp.ne.s32.totalorder %s1085_s1, %s734_s18  ;;  %p738_p1 = scmp.lt.u32.totalorder %s734_s18, %s1085_s1 }
   0x7   :  { %p740_p2 = pnand %p738_p1, %p735_p0 }
   0x9   :  { %743 = shalt.err (!%p740_p2)
}
   0xa   :  { %s744_s23 = scalar_lea.vmem %s30_s13, 128  ;;  %p749_p4 = scmp.lt.s32.totalorder %s30_s13, %s30_s13 }
   0xb   :  { %p745_p3 = scmp.ne.s32.totalorder %s30_s13, %s744_s23  ;;  %p750_p5 = scmp.lt.s32.totalorder %s744_s23, %s744_s23 }
   0xd   :  { %p751_p6 = por %p750_p5, %p749_p4 }
   0xf   :  { %p752_p7 = pnand %p751_p6, %p745_p3 }
  0x11   :  { %755 = shalt.err (!%p752_p7)
}
  0x12   :  { %32 = dma.hbm_to_vmem [thread:$0]  %s1085_s1, 128, %s30_s13, [#allocation7]  }
  0x13   :  { %s756_s28 = scalar_lea.hbm %s1084_s0, 512 }
  0x14   :  { %p757_p8 = scmp.ne.s32.totalorder %s1084_s0, %s756_s28  ;;  %p760_p9 = scmp.lt.u32.totalorder %s756_s28, %s1084_s0 }
  0x16   :  { %p762_p10 = pnand %p760_p9, %p757_p8 }
  0x18   :  { %765 = shalt.err (!%p762_p10)
}
  0x19   :  { %s766_s6 = scalar_lea.vmem %s862_s15, 512  ;;  %p771_p12 = scmp.lt.s32.totalorder %s862_s15, %s862_s15 }
  0x1a   :  { %p767_p11 = scmp.ne.s32.totalorder %s862_s15, %s766_s6  ;;  %p772_p13 = scmp.lt.s32.totalorder %s766_s6, %s766_s6 }
  0x1c   :  { %p773_p0 = por %p772_p13, %p771_p12 }
  0x1e   :  { %p774_p1 = pnand %p773_p0, %p767_p11 }
  0x20   :  { %777 = shalt.err (!%p774_p1)
}
  0x21   :  { %s830_s1 = smov 256   ;;  %s831_s7 = smov 16  }
  0x22   :  { %22 = dma.hbm_to_vmem [thread:$0]  %s1084_s0, 512, %s862_s15, [#allocation4], %s830_s1, %s830_s1, %s831_s7  }
  0x23   :  { %s832_s10 = smov [#allocation8]   ;;  %s778_s14 = scalar_lea.hbm %s1086_s2, 512 }
  0x24   :  { %s38_s11 = sshll.u32 %s832_s10, 4  ;;  %p779_p2 = scmp.ne.s32.totalorder %s1086_s2, %s778_s14  ;;  %s39_s11 = int_to_ptr.vmem [resolvable:$true] %s38_s11 }
  0x25   :  { %p782_p3 = scmp.lt.u32.totalorder %s778_s14, %s1086_s2 }
  0x27   :  { %p784_p4 = pnand %p782_p3, %p779_p2 }
  0x29   :  { %787 = shalt.err (!%p784_p4)
}
  0x2a   :  { %s788_s20 = scalar_lea.vmem %s39_s11, 512  ;;  %p793_p6 = scmp.lt.s32.totalorder %s39_s11, %s39_s11 }
  0x2b   :  { %p789_p5 = scmp.ne.s32.totalorder %s39_s11, %s788_s20  ;;  %p794_p7 = scmp.lt.s32.totalorder %s788_s20, %s788_s20 }
  0x2d   :  { %p795_p8 = por %p794_p7, %p793_p6 }
  0x2f   :  { %p796_p9 = pnand %p795_p8, %p789_p5 }
  0x31   :  { %799 = shalt.err (!%p796_p9)
}
  0x32   :  { %44 = dma.hbm_to_vmem [thread:$0]  %s1086_s2, 512, %s39_s11, [#allocation7], %s830_s1, %s830_s1, %s831_s7  }
  0x33   :  { %822 = dma.done.wait [#allocation4], 512  }
  0x34   :  { %823 = vsyncadd [#allocation4], 4294966784 }
  0x35   :  { %824 = dma.done.wait [#allocation7], 640  }
  0x36   :  { %825 = vsyncadd [#allocation7], 4294966656  ;;  %v911_v0 = vld [vmem:[#allocation3] sm:$0xff]  ;;  %s833_s21 = smov 17   ;;  %v916_v1 = vld [vmem:[#allocation3 + $0x8] sm:$0xff]  ;;  %s834_s2 = smov 15   ;;  %v60_v5 = vlaneseq }
  0x37   :  { %81 = vrot.lane.b32.xlu1 %v911_v0, %s831_s7  ;;  %56 = vrot.lane.b32.xlu0 %v911_v0, %s833_s21  ;;  %v921_v2 = vld [vmem:[#allocation3 + $0x18] sm:$0xff]  ;;  %v923_v3 = vld [vmem:[#allocation3 + $0x10] sm:$0xff]  ;;  %s835_s22 = smov 1   ;;  %s836_s23 = smov 127   ;;  %v839_v4 = vmov 0.0   ;;  %vm270_vm8 = vcmask 588800  }
  0x38   :  { %s837_s24 = smov 113   ;;  %s838_s25 = smov 112   ;;  %338 = vmatprep.mubr.f32.mxu0 %v839_v4  ;;  %634 = vmatprep.mubr.f32.mxu1 %v839_v4  ;;  %v68_v6 = vshrl.u32 %v60_v5, 7  ;;  %v955_v7 = vand.u32 127, %v60_v5 }
  0x39   :  { %s840_s26 = smov 111   ;;  %v89_v10 = vld [vmem:[#allocation8 + $0x1] ss:$8 sm:$0x3]  ;;  %s841_s27 = smov [#allocation9]  }
  0x3a   :  { %v957_v8 = vsub.s32 0, %v68_v6  ;;  %v959_v9 = vsub.s32 1, %v68_v6  ;;  %v65_v11 = vld [vmem:[#allocation8] ss:$8 sm:$0x3]  ;;  %vm85_vm0 = vcmp.lt.s32.totalorder %v955_v7, 16 }
  0x3b   :  { %83 = vrot.lane.b32.xlu1 %v916_v1, %s831_s7  ;;  %58 = vrot.lane.b32.xlu0 %v916_v1, %s833_s21  ;;  %vm62_vm1 = vcmp.lt.s32.totalorder %v955_v7, 17  ;;  %v376_v28 = vld [vmem:[#allocation8] ss:$8 sm:$0x3]  ;;  %vm109_vm2 = vcmp.lt.s32.totalorder %v955_v7, 15  ;;  %vm133_vm3 = vcmp.lt.s32.totalorder %v955_v7, 1 }
  0x3c   :  { %v94_v14 = vrot.slane %v89_v10, %v957_v8  ;;  %v70_v15 = vrot.slane %v65_v11, %v957_v8  ;;  %v74_v16 = vrot.slane %v65_v11, %v959_v9  ;;  %v98_v17 = vrot.slane %v89_v10, %v959_v9  ;;  %v398_v29 = vld [vmem:[#allocation8 + $0x1] ss:$8 sm:$0x3]  ;;  %v113_v46 = vld [vmem:[#allocation8 + $0x2] ss:$8 sm:$0x3] }
  0x3d   :  { %v381_v34 = vrot.slane %v376_v28, %v957_v8  ;;  %v403_v35 = vrot.slane %v398_v29, %v957_v8  ;;  %v385_v36 = vrot.slane %v376_v28, %v959_v9  ;;  %v407_v37 = vrot.slane %v398_v29, %v959_v9  ;;  %v137_v49 = vld [vmem:[#allocation8 + $0x3] ss:$8 sm:$0x3]  ;;  %v420_v11 = vld [vmem:[#allocation8 + $0x2] ss:$8 sm:$0x3] }
  0x3e   :  { %v118_v54 = vrot.slane %v113_v46, %v957_v8  ;;  %v122_v55 = vrot.slane %v113_v46, %v959_v9  ;;  %v142_v56 = vrot.slane %v137_v49, %v957_v8  ;;  %v146_v57 = vrot.slane %v137_v49, %v959_v9  ;;  %s669_s28 = sshll.u32 %s841_s27, 4  ;;  %s670_s28 = int_to_ptr.vmem [resolvable:$true] %s669_s28 }
  0x3f   :  { %372 = vrot.lane.b32.xlu1 %v921_v2, %s833_s21  ;;  %370 = vrot.lane.b32.xlu0 %v923_v3, %s833_s21  ;;  %vm159_vm4 = vcmp.lt.s32.totalorder %v955_v7, 127  ;;  %vm183_vm5 = vcmp.lt.s32.totalorder %v955_v7, 113  ;;  %vm207_vm6 = vcmp.lt.s32.totalorder %v955_v7, 112  ;;  %vm231_vm7 = vcmp.lt.s32.totalorder %v955_v7, 111  ;;  %s800_s29 = scalar_lea.vmem %s670_s28, 512  ;;  %p805_p11 = scmp.lt.s32.totalorder %s670_s28, %s670_s28 }
  0x40   :  { %p801_p10 = scmp.ne.s32.totalorder %s670_s28, %s800_s29  ;;  %p806_p12 = scmp.lt.s32.totalorder %s800_s29, %s800_s29 }
  0x42   :  { %p807_p13 = por %p806_p12, %p805_p11 }
  0x43   :  { %394 = vrot.lane.b32.xlu1 %v921_v2, %s831_s7  ;;  %392 = vrot.lane.b32.xlu0 %v923_v3, %s831_s7 }
  0x44   :  { %p808_p0 = pnand %p807_p13, %p801_p10 }
  0x47   :  { %107 = vrot.lane.b32.xlu1 %v916_v1, %s834_s2  ;;  %105 = vrot.lane.b32.xlu0 %v911_v0, %s834_s2 }
  0x4b   :  { %131 = vrot.lane.b32.xlu1 %v916_v1, %s835_s22  ;;  %129 = vrot.lane.b32.xlu0 %v911_v0, %s835_s22 }
  0x4f   :  { %416 = vrot.lane.b32.xlu1 %v921_v2, %s834_s2  ;;  %414 = vrot.lane.b32.xlu0 %v923_v3, %s834_s2 }
  0x53   :  { %438 = vrot.lane.b32.xlu1 %v921_v2, %s835_s22  ;;  %436 = vrot.lane.b32.xlu0 %v923_v3, %s835_s22 }
  0x57   :  { %157 = vrot.lane.b32.xlu1 %v916_v1, %s836_s23  ;;  %155 = vrot.lane.b32.xlu0 %v911_v0, %s836_s23 }
  0x5b   :  { %462 = vrot.lane.b32.xlu1 %v921_v2, %s836_s23  ;;  %460 = vrot.lane.b32.xlu0 %v923_v3, %s836_s23 }
  0x5f   :  { %181 = vrot.lane.b32.xlu1 %v916_v1, %s837_s24  ;;  %179 = vrot.lane.b32.xlu0 %v911_v0, %s837_s24 }
  0x63   :  { %205 = vrot.lane.b32.xlu1 %v916_v1, %s838_s25  ;;  %203 = vrot.lane.b32.xlu0 %v911_v0, %s838_s25 }
  0x67   :  { %484 = vrot.lane.b32.xlu1 %v921_v2, %s837_s24  ;;  %482 = vrot.lane.b32.xlu0 %v923_v3, %s837_s24 }
  0x6b   :  { %506 = vrot.lane.b32.xlu1 %v921_v2, %s838_s25  ;;  %504 = vrot.lane.b32.xlu0 %v923_v3, %s838_s25 }
  0x6f   :  { %229 = vrot.lane.b32.xlu1 %v916_v1, %s840_s26  ;;  %227 = vrot.lane.b32.xlu0 %v911_v0, %s840_s26 }
  0x73   :  { %528 = vrot.lane.b32.xlu1 %v921_v2, %s840_s26  ;;  %526 = vrot.lane.b32.xlu0 %v923_v3, %s840_s26 }
  0xa9   :  { %v82_v12 = vpop.permute.xlu1 %81  ;;  %v57_v13 = vpop.permute.xlu0 %56 }
  0xad   :  { %v84_v18 = vpop.permute.xlu1 %83  ;;  %v59_v19 = vpop.permute.xlu0 %58 }
  0xae   :  { %v86_v20 = vsel %vm85_vm0, %v82_v12, %v84_v18  ;;  %v87_v21 = vsel %vm85_vm0, %v84_v18, %v82_v12  ;;  %v63_v22 = vsel %vm62_vm1, %v57_v13, %v59_v19  ;;  %v64_v23 = vsel %vm62_vm1, %v59_v19, %v57_v13  ;;  %v442_v12 = vld [vmem:[#allocation8 + $0x3] ss:$8 sm:$0x3] }
  0xaf   :  { %v101_v24 = vmul.f32 %v94_v14, %v87_v21  ;;  %v77_v25 = vmul.f32 %v70_v15, %v64_v23  ;;  %v78_v26 = vmul.f32 %v74_v16, %v63_v22  ;;  %v102_v27 = vmul.f32 %v98_v17, %v86_v20  ;;  %v163_v21 = vld [vmem:[#allocation8 + $0x5] ss:$8 sm:$0x3] }
  0xb0   :  { %v425_v17 = vrot.slane %v420_v11, %v957_v8  ;;  %v429_v18 = vrot.slane %v420_v11, %v959_v9  ;;  %v447_v19 = vrot.slane %v442_v12, %v957_v8  ;;  %v451_v20 = vrot.slane %v442_v12, %v959_v9  ;;  %v488_v12 = vld [vmem:[#allocation8 + $0x6] ss:$8 sm:$0x3] }
  0xb1   :  { %v373_v30 = vpop.permute.xlu1 %372  ;;  %v371_v31 = vpop.permute.xlu0 %370  ;;  %v684_v32 = vpack.c.bf16 %v102_v27, %v78_v26  ;;  %v686_v33 = vpack.c.bf16 %v101_v24, %v77_v25  ;;  %v168_v28 = vrot.slane %v163_v21, %v957_v8  ;;  %v172_v29 = vrot.slane %v163_v21, %v959_v9 }
  0xb2   :  { %v374_v38 = vsel %vm62_vm1, %v371_v31, %v373_v30  ;;  %v375_v39 = vsel %vm62_vm1, %v373_v30, %v371_v31 }
  0xb3   :  { %685 = vmatprep.subr.bf16.mxu0 %v684_v32  ;;  %v388_v44 = vmul.f32 %v381_v34, %v375_v39  ;;  %v389_v47 = vmul.f32 %v385_v36, %v374_v38  ;;  %v466_v34 = vld [vmem:[#allocation8 + $0x5] ss:$8 sm:$0x3] }
  0xb4   :  { %687 = vmatpush1.bf16.msra.mxu0 %v686_v33 }
  0xb5   :  { %v395_v40 = vpop.permute.xlu1 %394  ;;  %v393_v41 = vpop.permute.xlu0 %392 }
  0xb6   :  { %v396_v42 = vsel %vm85_vm0, %v393_v41, %v395_v40  ;;  %v397_v43 = vsel %vm85_vm0, %v395_v40, %v393_v41 }
  0xb7   :  { %v410_v45 = vmul.f32 %v403_v35, %v397_v43  ;;  %v411_v48 = vmul.f32 %v407_v37, %v396_v42  ;;  %v471_v43 = vrot.slane %v466_v34, %v957_v8 }
  0xb9   :  { %v108_v50 = vpop.permute.xlu1 %107  ;;  %v106_v51 = vpop.permute.xlu0 %105  ;;  %v700_v52 = vpack.c.bf16 %v411_v48, %v389_v47  ;;  %v702_v53 = vpack.c.bf16 %v410_v45, %v388_v44  ;;  %v475_v44 = vrot.slane %v466_v34, %v959_v9 }
  0xba   :  { %v110_v58 = vsel %vm109_vm2, %v106_v51, %v108_v50  ;;  %v111_v59 = vsel %vm109_vm2, %v108_v50, %v106_v51 }
  0xbb   :  { %701 = vmatprep.subr.bf16.mxu1 %v700_v52  ;;  %v125_v4 = vmul.f32 %v118_v54, %v111_v59  ;;  %v126_v5 = vmul.f32 %v122_v55, %v110_v58  ;;  %v211_v54 = vld [vmem:[#allocation8 + $0x7] ss:$8 sm:$0x3] }
  0xbc   :  { %703 = vmatpush1.bf16.msra.mxu1 %v702_v53  ;;  %v187_v53 = vld [vmem:[#allocation8 + $0x6] ss:$8 sm:$0x3]  ;;  %v216_v59 = vrot.slane %v211_v54, %v957_v8 }
  0xbd   :  { %v132_v60 = vpop.permute.xlu1 %131  ;;  %v130_v61 = vpop.permute.xlu0 %129  ;;  %v196_v58 = vrot.slane %v187_v53, %v959_v9 }
  0xbe   :  { %v134_v62 = vsel %vm133_vm3, %v130_v61, %v132_v60  ;;  %v135_v63 = vsel %vm133_vm3, %v132_v60, %v130_v61  ;;  %v220_v60 = vrot.slane %v211_v54, %v959_v9 }
  0xbf   :  { %v149_v6 = vmul.f32 %v142_v56, %v135_v63  ;;  %v150_v10 = vmul.f32 %v146_v57, %v134_v62  ;;  %v192_v57 = vrot.slane %v187_v53, %v957_v8 }
  0xc1   :  { %v417_v13 = vpop.permute.xlu1 %416  ;;  %v415_v14 = vpop.permute.xlu0 %414  ;;  %v688_v15 = vpack.c.bf16 %v150_v10, %v126_v5  ;;  %v690_v16 = vpack.c.bf16 %v149_v6, %v125_v4 }
  0xc2   :  { %v418_v22 = vsel %vm109_vm2, %v415_v14, %v417_v13  ;;  %v419_v23 = vsel %vm109_vm2, %v417_v13, %v415_v14  ;;  %v510_v13 = vld [vmem:[#allocation8 + $0x7] ss:$8 sm:$0x3] }
  0xc3   :  { %689 = vmatprep.subr.bf16.mxu0 %v688_v15  ;;  %v432_v30 = vmul.f32 %v425_v17, %v419_v23  ;;  %v433_v31 = vmul.f32 %v429_v18, %v418_v22  ;;  %v493_v18 = vrot.slane %v488_v12, %v957_v8  ;;  %v519_v21 = vrot.slane %v510_v13, %v959_v9  ;;  %v235_v22 = vld [vmem:[#allocation8 + $0x10] ss:$8 sm:$0x3] }
  0xc4   :  { %691 = vmatpush1.bf16.msra.mxu0 %v690_v16 }
  0xc5   :  { %v439_v24 = vpop.permute.xlu1 %438  ;;  %v437_v25 = vpop.permute.xlu0 %436 }
  0xc6   :  { %v440_v26 = vsel %vm133_vm3, %v437_v25, %v439_v24  ;;  %v441_v27 = vsel %vm133_vm3, %v439_v24, %v437_v25 }
  0xc7   :  { %v454_v32 = vmul.f32 %v447_v19, %v441_v27  ;;  %v455_v33 = vmul.f32 %v451_v20, %v440_v26  ;;  %v497_v19 = vrot.slane %v488_v12, %v959_v9  ;;  %v515_v20 = vrot.slane %v510_v13, %v957_v8 }
  0xc9   :  { %v158_v35 = vpop.permute.xlu1 %157  ;;  %v156_v36 = vpop.permute.xlu0 %155  ;;  %v704_v37 = vpack.c.bf16 %v455_v33, %v433_v31  ;;  %v706_v38 = vpack.c.bf16 %v454_v32, %v432_v30  ;;  %v244_v30 = vrot.slane %v235_v22, %v959_v9 }
  0xca   :  { %v160_v39 = vsel %vm159_vm4, %v156_v36, %v158_v35  ;;  %v161_v40 = vsel %vm159_vm4, %v158_v35, %v156_v36  ;;  %v532_v35 = vld [vmem:[#allocation8 + $0x10] ss:$8 sm:$0x3] }
  0xcb   :  { %v175_v41 = vmul.f32 %v168_v28, %v160_v39  ;;  %v176_v42 = vmul.f32 %v172_v29, %v161_v40  ;;  %705 = vmatprep.subr.bf16.mxu1 %v704_v37  ;;  %v240_v29 = vrot.slane %v235_v22, %v957_v8 }
  0xcc   :  { %707 = vmatpush1.bf16.msra.mxu1 %v706_v38 }
  0xcd   :  { %v463_v45 = vpop.permute.xlu1 %462  ;;  %v461_v46 = vpop.permute.xlu0 %460  ;;  %v692_v47 = vpack.c.bf16 %v176_v42, %v916_v1  ;;  %v694_v48 = vpack.c.bf16 %v175_v41, %v911_v0 }
  0xce   :  { %v464_v49 = vsel %vm159_vm4, %v461_v46, %v463_v45  ;;  %v465_v50 = vsel %vm159_vm4, %v463_v45, %v461_v46  ;;  %v541_v45 = vrot.slane %v532_v35, %v959_v9  ;;  %v251_v46 = vld [vmem:[#allocation6] sm:$0xff] }
  0xcf   :  { %v478_v51 = vmul.f32 %v471_v43, %v464_v49  ;;  %v479_v52 = vmul.f32 %v475_v44, %v465_v50  ;;  %693 = vmatprep.subr.bf16.mxu0 %v692_v47  ;;  %v537_v44 = vrot.slane %v532_v35, %v957_v8 }
  0xd0   :  { %695 = vmatpush1.bf16.msra.mxu0 %v694_v48 }
  0xd1   :  { %v182_v55 = vpop.permute.xlu1 %181  ;;  %v180_v56 = vpop.permute.xlu0 %179  ;;  %v708_v1 = vpack.c.bf16 %v479_v52, %v921_v2  ;;  %v710_v0 = vpack.c.bf16 %v478_v51, %v923_v3 }
  0xd2   :  { %v184_v61 = vsel %vm183_vm5, %v180_v56, %v182_v55  ;;  %v185_v62 = vsel %vm183_vm5, %v182_v55, %v180_v56 }
  0xd3   :  { %709 = vmatprep.subr.bf16.mxu1 %v708_v1  ;;  %v199_v5 = vmul.f32 %v192_v57, %v184_v61  ;;  %v200_v6 = vmul.f32 %v196_v58, %v185_v62 }
  0xd4   :  { %711 = vmatpush1.bf16.msra.mxu1 %v710_v0 }
  0xd5   :  { %v206_v2 = vpop.permute.xlu1 %205  ;;  %v204_v3 = vpop.permute.xlu0 %203 }
  0xd6   :  { %v208_v63 = vsel %vm207_vm6, %v204_v3, %v206_v2  ;;  %v209_v4 = vsel %vm207_vm6, %v206_v2, %v204_v3 }
  0xd7   :  { %v223_v10 = vmul.f32 %v216_v59, %v208_v63  ;;  %v224_v11 = vmul.f32 %v220_v60, %v209_v4 }
  0xd9   :  { %v485_v14 = vpop.permute.xlu1 %484  ;;  %v483_v15 = vpop.permute.xlu0 %482  ;;  %v696_v16 = vpack.c.bf16 %v224_v11, %v200_v6  ;;  %v698_v17 = vpack.c.bf16 %v223_v10, %v199_v5 }
  0xda   :  { %v486_v23 = vsel %vm183_vm5, %v483_v15, %v485_v14  ;;  %v487_v24 = vsel %vm183_vm5, %v485_v14, %v483_v15 }
  0xdb   :  { %697 = vmatprep.subr.bf16.mxu0 %v696_v16  ;;  %v500_v31 = vmul.f32 %v493_v18, %v486_v23  ;;  %v501_v32 = vmul.f32 %v497_v19, %v487_v24 }
  0xdc   :  { %699 = vmatpush1.bf16.msra.mxu0 %v698_v17 }
  0xdd   :  { %v507_v25 = vpop.permute.xlu1 %506  ;;  %v505_v26 = vpop.permute.xlu0 %504 }
  0xde   :  { %v508_v27 = vsel %vm207_vm6, %v505_v26, %v507_v25  ;;  %v509_v28 = vsel %vm207_vm6, %v507_v25, %v505_v26 }
  0xdf   :  { %v522_v33 = vmul.f32 %v515_v20, %v508_v27  ;;  %v523_v34 = vmul.f32 %v519_v21, %v509_v28 }
  0xe1   :  { %v230_v36 = vpop.permute.xlu1 %229  ;;  %v228_v37 = vpop.permute.xlu0 %227  ;;  %v712_v38 = vpack.c.bf16 %v523_v34, %v501_v32  ;;  %v714_v39 = vpack.c.bf16 %v522_v33, %v500_v31 }
  0xe2   :  { %v232_v40 = vsel %vm231_vm7, %v228_v37, %v230_v36  ;;  %v233_v41 = vsel %vm231_vm7, %v230_v36, %v228_v37 }
  0xe3   :  { %v247_v42 = vmul.f32 %v240_v29, %v232_v40  ;;  %v248_v43 = vmul.f32 %v244_v30, %v233_v41  ;;  %713 = vmatprep.subr.bf16.mxu1 %v712_v38 }
  0xe4   :  { %715 = vmatpush1.bf16.msra.mxu1 %v714_v39 }
  0xe5   :  { %v529_v47 = vpop.permute.xlu1 %528  ;;  %290 = vmatprep.subr.mxu0 %v248_v43  ;;  %v527_v48 = vpop.permute.xlu0 %526 }
  0xe6   :  { %v530_v49 = vsel %vm231_vm7, %v527_v48, %v529_v47  ;;  %v531_v50 = vsel %vm231_vm7, %v529_v47, %v527_v48  ;;  %291 = vmatpush1.msra.mxu0 %v247_v42 }
  0xe7   :  { %v544_v51 = vmul.f32 %v537_v44, %v530_v49  ;;  %v545_v52 = vmul.f32 %v541_v45, %v531_v50  ;;  %682 = vmatmul.mubr.msk.f32.vlgmr.msra.gmra.mrb[0].mxu0 %vm270_vm8, %v251_v46 }
  0xe9   :  { %586 = vmatprep.subr.mxu1 %v545_v52 }
  0xea   :  { %587 = vmatpush1.msra.mxu1 %v544_v51 }
  0xeb   :  { %683 = vmatmul.mubr.msk.f32.vlgmr.msra.gmra.mrb[0].mxu1 %vm270_vm8, %v251_v46 }
 0x1ba   :  { %v340_v8 = vpop.f32.mrb[0].mxu0 }
 0x1bb   :  { %v342_v9 = vpop.f32.mrb[1].mxu0 }
 0x1bc   :  { %v345_v53 = vadd.f32 %v342_v9, %v340_v8 }
 0x1be   :  { %346 = vadd.xlane.f32.xlu0 %v345_v53  ;;  %v636_v54 = vpop.f32.mrb[0].mxu1 }
 0x1bf   :  { %v638_v55 = vpop.f32.mrb[1].mxu1 }
 0x1c0   :  { %v641_v56 = vadd.f32 %v638_v55, %v636_v54 }
 0x1c2   :  { %642 = vadd.xlane.f32.xlu1 %v641_v56 }
 0x24b   :  { %v347_v1 = vpop.xlane.xlu0 %346 }
 0x24c   :  { %v348_v0 = vmul.f32 0.00390625, %v347_v1 }
 0x24e   :  { %v349_v57 = vsub.f32 %v340_v8, %v348_v0  ;;  %v350_v7 = vsub.f32 %v342_v9, %v348_v0 }
 0x24f   :  { %v643_v58 = vpop.xlane.xlu1 %642 }
 0x250   :  { %v644_v59 = vmul.f32 0.00390625, %v643_v58  ;;  %v351_v60 = vmul.f32 %v349_v57, %v349_v57  ;;  %v352_v61 = vmul.f32 %v350_v7, %v350_v7 }
 0x252   :  { %v645_v62 = vsub.f32 %v636_v54, %v644_v59  ;;  %v646_v2 = vsub.f32 %v638_v55, %v644_v59  ;;  %v353_v3 = vadd.f32 %v352_v61, %v351_v60 }
 0x254   :  { %354 = vadd.xlane.f32.xlu0 %v353_v3  ;;  %v647_v63 = vmul.f32 %v645_v62, %v645_v62  ;;  %v648_v4 = vmul.f32 %v646_v2, %v646_v2 }
 0x256   :  { %v649_v5 = vadd.f32 %v648_v4, %v647_v63 }
 0x258   :  { %650 = vadd.xlane.f32.xlu0 %v649_v5 }
 0x2e1   :  { %v355_v6 = vpop.xlane.xlu0 %354 }
 0x2e2   :  { %v356_v10 = vmul.f32 0.00390625, %v355_v6 }
 0x2e4   :  { %v357_v11 = vadd.f32 1e-05, %v356_v10 }
 0x2e5   :  { %v651_v12 = vpop.xlane.xlu0 %650 }
 0x2e6   :  { %730 = vrsqrt.f32 %v357_v11  ;;  %v652_v13 = vmul.f32 0.00390625, %v651_v12 }
 0x2e8   :  { %v653_v14 = vadd.f32 1e-05, %v652_v13 }
 0x2ea   :  { %732 = vrsqrt.f32 %v653_v14 }
 0x2f0   :  { %v731_v15 = vpop.eup %730 }
 0x2f1   :  { %v359_v16 = vmul.f32 %v731_v15, %v349_v57  ;;  %v360_v17 = vmul.f32 %v731_v15, %v350_v7 }
 0x2f3   :  { %v361_v18 = vmul.f32 0.01, %v359_v16  ;;  %v362_v19 = vmul.f32 0.01, %v360_v17 }
 0x2f4   :  { %v733_v20 = vpop.eup %732 }
 0x2f5   :  { %v655_v21 = vmul.f32 %v733_v20, %v645_v62  ;;  %v656_v22 = vmul.f32 %v733_v20, %v646_v2  ;;  %v363_v23 = vmax.f32 %v359_v16, %v361_v18  ;;  %v364_v24 = vmax.f32 %v360_v17, %v362_v19 }
 0x2f7   :  { %365 = vst [vmem:[#allocation9] sm:$0xff] %v363_v23  ;;  %366 = vst [vmem:[#allocation9 + $0x8] sm:$0xff] %v364_v24  ;;  %v657_v25 = vmul.f32 0.01, %v655_v21  ;;  %v658_v26 = vmul.f32 0.01, %v656_v22 }
 0x2f9   :  { %v659_v27 = vmax.f32 %v655_v21, %v657_v25  ;;  %v660_v28 = vmax.f32 %v656_v22, %v658_v26 }
 0x2fb   :  { %662 = vst [vmem:[#allocation9 + $0x10] sm:$0xff] %v659_v27  ;;  %663 = vst [vmem:[#allocation9 + $0x18] sm:$0xff] %v660_v28 }
 0x2fc   :  { %811 = shalt.err (!%p808_p0)
}
 0x2fd   :  { %s812_s5 = scalar_lea.hbm %s1087_s3, 512 }
 0x2fe   :  { %p813_p1 = scmp.ne.s32.totalorder %s1087_s3, %s812_s5  ;;  %p816_p2 = scmp.lt.u32.totalorder %s812_s5, %s1087_s3 }
 0x300   :  { %p818_p3 = pnand %p816_p2, %p813_p1 }
 0x302   :  { %821 = shalt.err (!%p818_p3)
}
 0x303   :  { %675 = dma.vmem_to_hbm [thread:$0]  %s670_s28, 512, %s1087_s3, [#allocation5], %s830_s1, %s830_s1, %s831_s7  }
 0x304   :  { %826 = dma.done.wait [#allocation5], 512  }
 0x305   :  { %827 = vsyncadd [#allocation5], 4294966784 }
 0x306   :  { %679 = vsyncpa [#allocation4], 1 }
 0x307   :  { %680 = vsyncpa [#allocation7], 1 }
 0x308   :  { %681 = vsyncpa [#allocation5], 1 }

</bundles_post_ra>
